<compile_context>
chip_gen: v7x
topology: tpu7x:2x2x1
jax: 0.10.0
libtpu: 0.0.40
codegen_flags: <defaults>
</compile_context>

<pallas_src>
import functools

import numpy as np
import jax
import jax.numpy as jnp
from jax.experimental import pallas as pl
from jax.experimental.pallas import tpu as pltpu

HIDDEN_PAD = 128  # logical hidden size is 100; padded to one full lane group


def _round_up(x, m):
    return (x + m - 1) // m * m


def _elu(v):
    # ELU(alpha=1): v if v > 0 else exp(v) - 1
    # TODO(synk): switch to jnp.expm1 once a Mosaic lowering for expm1 is guaranteed;
    #             difference is <~1e-7 absolute in f32 for the active range here.
    return jnp.where(v > 0, v, jnp.exp(v) - 1.0)


# ----------------------------------------------------------------------------
# Pallas kernel: fused 4-layer MLP for one batch tile (concat already fused in
# the wrapper into a single lane-contiguous bf16 input).
# ----------------------------------------------------------------------------
def _surrogate_mlp_kernel(x_ref, w1_ref, b1_ref, w2_ref, b2_ref,
                          w3_ref, b3_ref, w4_ref, b4_ref, o_ref, *, n_out):
    bf16 = jnp.bfloat16
    f32 = jnp.float32

    def dot(a, w_ref):
        # bf16 operands, f32 accumulation on the MXU (valid on v5e/v6e/v7x).
        return jnp.dot(a, w_ref[...], preferred_element_type=f32)

    # Bias-add / ELU epilogues stay f32 (v5e has no bf16 VPU/EUP); the hidden
    # activations are carried bf16 between layers to halve vreg pressure.
    h = _elu(dot(x_ref[...], w1_ref) + b1_ref[...]).astype(bf16)
    h = _elu(dot(h, w2_ref) + b2_ref[...]).astype(bf16)
    h = _elu(dot(h, w3_ref) + b3_ref[...]).astype(bf16)
    o = dot(h, w4_ref) + b4_ref[...]            # (tile_b, 128) f32, full-width MXU N
    # Only the first n_out columns are kept -> narrow HBM store (masked vst),
    # ~128/n_out fewer write bytes than storing the padded slab.
    o_ref[...] = o[:, :n_out].astype(o_ref.dtype)


# ----------------------------------------------------------------------------
# Wrapper: Surrogate.forward semantics (tile/fold 1-D parameters, view time_step),
# batch-tiled grid, weights VMEM-resident across tiles.
# ----------------------------------------------------------------------------
def surrogate_mlp(kparams, parameters, targets, context, reconstructed, time_step,
                  *, num_reconstructed, tile_b=512):
    f32, bf16 = jnp.float32, jnp.bfloat16
    B = targets.shape[0]
    H = kparams["w2"].shape[0]
    n_out = num_reconstructed

    ts = jnp.reshape(time_step, (-1, 1)).astype(f32)
    w1, b1 = kparams["w1"], kparams["b1"]

    if parameters.ndim == 1:
        # Shared detector parameters: fold their constant layer-1 contribution
        # into the bias instead of tiling them to (B, P) and re-multiplying per row.
        P = parameters.shape[-1]
        b1 = b1 + parameters[None, :].astype(f32) @ w1[:P].astype(f32)
        w1 = w1[P:]
        feats = [targets, context, reconstructed, ts]
    else:
        feats = [parameters, targets, context, reconstructed, ts]

    # Fused torch.cat: one lane-contiguous (B, Dx) bf16 input, one layer-1 matmul.
    x = jnp.concatenate([f.astype(f32) for f in feats], axis=1).astype(bf16)
    Dx = x.shape[1]

    # Batch tiling: sublane-aligned; capped so the grid has >= 2 steps whenever the
    # batch allows it (v7x: shard the parallel axis over both TCs; ~free on 1-TC chips
    # because the weights stay resident).
    tile_b = max(8, min(tile_b, _round_up(B, 8)))
    if B >= 16:
        tile_b = min(tile_b, _round_up((B + 1) // 2, 8))
    Bp = _round_up(B, tile_b)
    if Bp != B:
        x = jnp.pad(x, ((0, Bp - B), (0, 0)))
    grid = (Bp // tile_b,)

    def resident_spec(shape):
        # Same block index for every grid step -> stays resident in VMEM,
        # no re-DMA of weights per batch tile.
        return pl.BlockSpec(shape, lambda i: (0, 0))

    weight_args = (w1, b1, kparams["w2"], kparams["b2"],
                   kparams["w3"], kparams["b3"], kparams["w4"], kparams["b4"])
    flops = 2 * Bp * H * (Dx + 3 * H)
    bytes_accessed = (
        Bp * Dx * 2 + Bp * n_out * 4
        + sum(int(np.prod(v.shape)) * v.dtype.itemsize for v in weight_args))
    cost = pl.CostEstimate(flops=int(flops),
                           transcendentals=int(3 * Bp * H),
                           bytes_accessed=int(bytes_accessed))

    out = pl.pallas_call(
        functools.partial(_surrogate_mlp_kernel, n_out=n_out),
        out_shape=jax.ShapeDtypeStruct((Bp, n_out), f32),
        grid=grid,
        in_specs=[
            pl.BlockSpec((tile_b, Dx), lambda i: (i, 0)),
            resident_spec((Dx, H)), resident_spec((1, H)),
            resident_spec((H, H)), resident_spec((1, H)),
            resident_spec((H, H)), resident_spec((1, H)),
            resident_spec((H, H)), resident_spec((1, H)),
        ],
        out_specs=pl.BlockSpec((tile_b, n_out), lambda i: (i, 0)),
        compiler_params=pltpu.CompilerParams(
            dimension_semantics=("parallel",)),   # v7x: shard batch tiles over 2 TCs
        cost_estimate=cost,
    )(x, *weight_args)

    return out[:B]


# ----------------------------------------------------------------------------
# Parameter init (PyTorch-Linear-style uniform(-1/sqrt(fan_in), ...)) at the
# LOGICAL sizes, plus a prep step that pads/casts for the kernel.
# ----------------------------------------------------------------------------
def init_raw_params(key, num_parameters, num_targets, num_context, num_reconstructed,
                    hidden=100):
    d_in = num_parameters + num_targets + num_context + num_reconstructed + 1
    dims = [(d_in, hidden), (hidden, hidden), (hidden, hidden), (hidden, num_reconstructed)]
    raw = []
    for fan_in, fan_out in dims:
        key, kw, kb = jax.random.split(key, 3)
        bound = 1.0 / np.sqrt(fan_in)
        # NOTE: stored as [in, out] (transposed vs. PyTorch's [out, in]).
        w = jax.random.uniform(kw, (fan_in, fan_out), jnp.float32, -bound, bound)
        b = jax.random.uniform(kb, (fan_out,), jnp.float32, -bound, bound)
        raw.append((w, b))
    return raw


def prepare_kernel_params(raw, hidden_pad=HIDDEN_PAD):
    (w1, b1), (w2, b2), (w3, b3), (w4, b4) = raw
    H = hidden_pad
    bf16 = jnp.bfloat16
    assert w4.shape[1] <= H, "num_reconstructed must be <= HIDDEN_PAD"

    def pad_w(w, rows, cols):
        return jnp.pad(w, ((0, rows - w.shape[0]), (0, cols - w.shape[1])))

    def pad_b(b, cols):
        return jnp.pad(b, (0, cols - b.shape[0])).reshape(1, cols).astype(jnp.float32)

    return {
        # Single fused [D_in, H] layer-1 weight; row order == cat column order:
        # parameters | targets | context | reconstructed | time_step.
        "w1": pad_w(w1, w1.shape[0], H).astype(bf16),
        "b1": pad_b(b1, H),
        "w2": pad_w(w2, H, H).astype(bf16),
        "b2": pad_b(b2, H),
        "w3": pad_w(w3, H, H).astype(bf16),
        "b3": pad_b(b3, H),
        # Output weight padded to 128 columns so the MXU runs full-width N; the
        # kernel only stores the first num_reconstructed columns to HBM.
        "w4": pad_w(w4, H, H).astype(bf16),
        "b4": pad_b(b4, H),
    }


# ----------------------------------------------------------------------------
# Pure-JAX references for verification.
# ----------------------------------------------------------------------------
def ref_forward_f32(raw, parameters, targets, context, reconstructed, time_step):
    if parameters.ndim == 1:
        parameters = jnp.tile(parameters[None, :], (targets.shape[0], 1))
    x = jnp.concatenate([parameters, targets, context, reconstructed,
                         jnp.reshape(time_step, (-1, 1))], axis=1).astype(jnp.float32)
    (w1, b1), (w2, b2), (w3, b3), (w4, b4) = raw
    h = _elu(x @ w1 + b1)
    h = _elu(h @ w2 + b2)
    h = _elu(h @ w3 + b3)
    return h @ w4 + b4


def ref_forward_matched(kp, parameters, targets, context, reconstructed, time_step, n_out):
    """Mirrors the kernel's bf16-matmul / f32-accumulate / bf16-activation path."""
    bf16, f32 = jnp.bfloat16, jnp.float32
    ts = jnp.reshape(time_step, (-1, 1)).astype(f32)
    w1, b1 = kp["w1"], kp["b1"]
    if parameters.ndim == 1:
        P = parameters.shape[-1]
        b1 = b1 + parameters[None, :].astype(f32) @ w1[:P].astype(f32)
        w1 = w1[P:]
        feats = [targets, context, reconstructed, ts]
    else:
        feats = [parameters, targets, context, reconstructed, ts]
    x = jnp.concatenate([f.astype(f32) for f in feats], axis=1).astype(bf16)

    def dot(a, w):
        return jnp.dot(a, w, preferred_element_type=f32)

    h = _elu(dot(x, w1) + b1).astype(bf16)
    h = _elu(dot(h, kp["w2"]) + kp["b2"]).astype(bf16)
    h = _elu(dot(h, kp["w3"]) + kp["b3"]).astype(bf16)
    o = dot(h, kp["w4"]) + kp["b4"]
    return o[:, :n_out]


if __name__ == "__main__":
    num_parameters, num_targets, num_context, num_reconstructed = 4, 3, 2, 3
    batch = 256            # exercises the 2-step batch grid (tile_b capped to 128)
    n_time_steps = 100

    key = jax.random.PRNGKey(0)
    key, k_par, k_tgt, k_ctx, k_rec, k_ts = jax.random.split(key, 6)

    raw = init_raw_params(key, num_parameters, num_targets, num_context, num_reconstructed)
    kparams = prepare_kernel_params(raw)

    parameters = jax.random.normal(k_par, (batch, num_parameters), jnp.float32)
    targets = jax.random.normal(k_tgt, (batch, num_targets), jnp.float32)
    context = jax.random.normal(k_ctx, (batch, num_context), jnp.float32)
    reconstructed = jax.random.normal(k_rec, (batch, num_reconstructed), jnp.float32)
    ts_int = jax.random.randint(k_ts, (batch,), 1, n_time_steps + 1)
    time_step = ts_int.astype(jnp.float32) / n_time_steps

    fwd = jax.jit(functools.partial(surrogate_mlp, num_reconstructed=num_reconstructed))
    out = fwd(kparams, parameters, targets, context, reconstructed, time_step)
    out = jax.block_until_ready(out)
    assert out.shape == (batch, num_reconstructed)

    # 1) Tight check against a reference matching the kernel's precision
    #    (bf16 matmul operands, f32 accumulate, f32 epilogue, bf16 activations).
    ref_m = ref_forward_matched(kparams, parameters, targets, context, reconstructed,
                                time_step, num_reconstructed)
    np.testing.assert_allclose(np.asarray(out), np.asarray(ref_m), rtol=1e-4, atol=1e-4)

    # 2) Loose sanity check against the full-f32 (PyTorch-semantics) reference;
    #    differences are only bf16 weight/activation quantization.
    ref_f = ref_forward_f32(raw, parameters, targets, context, reconstructed, time_step)
    np.testing.assert_allclose(np.asarray(out), np.asarray(ref_f), rtol=0.0, atol=5e-2)

    # 3) Shared (1-D) parameters path: contribution folded into the layer-1 bias.
    out1 = jax.jit(functools.partial(surrogate_mlp, num_reconstructed=num_reconstructed))(
        kparams, parameters[0], targets, context, reconstructed, time_step)
    out1 = jax.block_until_ready(out1)
    ref1 = ref_forward_matched(kparams, parameters[0], targets, context, reconstructed,
                               time_step, num_reconstructed)
    np.testing.assert_allclose(np.asarray(out1), np.asarray(ref1), rtol=1e-4, atol=1e-4)

    print("KERNEL_OK")
</pallas_src>

<mosaic_0001>
module attributes {stable_mosaic.version = 11 : i64} {
  func.func @_surrogate_mlp_kernel(%arg0: i32, %arg1: memref<128x13xbf16, #tpu.memory_space<vmem>>, %arg2: memref<13x128xbf16, #tpu.memory_space<vmem>>, %arg3: memref<1x128xf32, #tpu.memory_space<vmem>>, %arg4: memref<128x128xbf16, #tpu.memory_space<vmem>>, %arg5: memref<1x128xf32, #tpu.memory_space<vmem>>, %arg6: memref<128x128xbf16, #tpu.memory_space<vmem>>, %arg7: memref<1x128xf32, #tpu.memory_space<vmem>>, %arg8: memref<128x128xbf16, #tpu.memory_space<vmem>>, %arg9: memref<1x128xf32, #tpu.memory_space<vmem>>, %arg10: memref<128x3xf32, #tpu.memory_space<vmem>>) attributes {dimension_semantics = [#tpu.dimension_semantics<parallel>], iteration_bounds = array<i64: 2>, scalar_prefetch = 0 : i64, scratch_operands = 0 : i64, tpu.core_type = #tpu.core_type<tc>, window_params = [{transform_indices = @transform_0, window_bounds = array<i64: 128, 13>}, {pipeline_mode = #tpu.pipeline_mode<synchronous>, transform_indices = @transform_1, window_bounds = array<i64: 13, 128>}, {pipeline_mode = #tpu.pipeline_mode<synchronous>, transform_indices = @transform_2, window_bounds = array<i64: 1, 128>}, {pipeline_mode = #tpu.pipeline_mode<synchronous>, transform_indices = @transform_3, window_bounds = array<i64: 128, 128>}, {pipeline_mode = #tpu.pipeline_mode<synchronous>, transform_indices = @transform_4, window_bounds = array<i64: 1, 128>}, {pipeline_mode = #tpu.pipeline_mode<synchronous>, transform_indices = @transform_5, window_bounds = array<i64: 128, 128>}, {pipeline_mode = #tpu.pipeline_mode<synchronous>, transform_indices = @transform_6, window_bounds = array<i64: 1, 128>}, {pipeline_mode = #tpu.pipeline_mode<synchronous>, transform_indices = @transform_7, window_bounds = array<i64: 128, 128>}, {pipeline_mode = #tpu.pipeline_mode<synchronous>, transform_indices = @transform_8, window_bounds = array<i64: 1, 128>}, {transform_indices = @transform_9, window_bounds = array<i64: 128, 3>}]} {
    %c0 = arith.constant 0 : index
    %c0_0 = arith.constant 0 : index
    %0 = vector.load %arg1[%c0, %c0_0] : memref<128x13xbf16, #tpu.memory_space<vmem>>, vector<128x13xbf16>
    %c0_1 = arith.constant 0 : index
    %c0_2 = arith.constant 0 : index
    %1 = vector.load %arg2[%c0_1, %c0_2] : memref<13x128xbf16, #tpu.memory_space<vmem>>, vector<13x128xbf16>
    %cst = arith.constant dense<0.000000e+00> : vector<128x128xf32>
    %2 = tpu.matmul %0, %1, %cst {dimension_numbers = #tpu.dot_dimension_numbers<[1], [0], [0], [1], [0, 0, 1, 1], [], []>} : vector<128x13xbf16>, vector<13x128xbf16>, vector<128x128xf32> -> vector<128x128xf32>
    %c0_3 = arith.constant 0 : index
    %c0_4 = arith.constant 0 : index
    %3 = vector.load %arg3[%c0_3, %c0_4] : memref<1x128xf32, #tpu.memory_space<vmem>>, vector<1x128xf32>
    %4 = vector.broadcast %3 : vector<1x128xf32> to vector<128x128xf32>
    %5 = arith.addf %2, %4 : vector<128x128xf32>
    %cst_5 = arith.constant 0.000000e+00 : f32
    %6 = vector.broadcast %cst_5 : f32 to vector<128x128xf32>
    %7 = arith.cmpf ogt, %5, %6 : vector<128x128xf32>
    %8 = math.exp %5 : vector<128x128xf32>
    %cst_6 = arith.constant 1.000000e+00 : f32
    %9 = vector.broadcast %cst_6 : f32 to vector<128x128xf32>
    %10 = arith.subf %8, %9 : vector<128x128xf32>
    %11 = arith.select %7, %5, %10 : vector<128x128xi1>, vector<128x128xf32>
    %12 = arith.truncf %11 : vector<128x128xf32> to vector<128x128xbf16>
    %c0_7 = arith.constant 0 : index
    %c0_8 = arith.constant 0 : index
    %13 = vector.load %arg4[%c0_7, %c0_8] : memref<128x128xbf16, #tpu.memory_space<vmem>>, vector<128x128xbf16>
    %cst_9 = arith.constant dense<0.000000e+00> : vector<128x128xf32>
    %14 = tpu.matmul %12, %13, %cst_9 {dimension_numbers = #tpu.dot_dimension_numbers<[1], [0], [0], [1], [0, 0, 1, 1], [], []>} : vector<128x128xbf16>, vector<128x128xbf16>, vector<128x128xf32> -> vector<128x128xf32>
    %c0_10 = arith.constant 0 : index
    %c0_11 = arith.constant 0 : index
    %15 = vector.load %arg5[%c0_10, %c0_11] : memref<1x128xf32, #tpu.memory_space<vmem>>, vector<1x128xf32>
    %16 = vector.broadcast %15 : vector<1x128xf32> to vector<128x128xf32>
    %17 = arith.addf %14, %16 : vector<128x128xf32>
    %cst_12 = arith.constant 0.000000e+00 : f32
    %18 = vector.broadcast %cst_12 : f32 to vector<128x128xf32>
    %19 = arith.cmpf ogt, %17, %18 : vector<128x128xf32>
    %20 = math.exp %17 : vector<128x128xf32>
    %cst_13 = arith.constant 1.000000e+00 : f32
    %21 = vector.broadcast %cst_13 : f32 to vector<128x128xf32>
    %22 = arith.subf %20, %21 : vector<128x128xf32>
    %23 = arith.select %19, %17, %22 : vector<128x128xi1>, vector<128x128xf32>
    %24 = arith.truncf %23 : vector<128x128xf32> to vector<128x128xbf16>
    %c0_14 = arith.constant 0 : index
    %c0_15 = arith.constant 0 : index
    %25 = vector.load %arg6[%c0_14, %c0_15] : memref<128x128xbf16, #tpu.memory_space<vmem>>, vector<128x128xbf16>
    %cst_16 = arith.constant dense<0.000000e+00> : vector<128x128xf32>
    %26 = tpu.matmul %24, %25, %cst_16 {dimension_numbers = #tpu.dot_dimension_numbers<[1], [0], [0], [1], [0, 0, 1, 1], [], []>} : vector<128x128xbf16>, vector<128x128xbf16>, vector<128x128xf32> -> vector<128x128xf32>
    %c0_17 = arith.constant 0 : index
    %c0_18 = arith.constant 0 : index
    %27 = vector.load %arg7[%c0_17, %c0_18] : memref<1x128xf32, #tpu.memory_space<vmem>>, vector<1x128xf32>
    %28 = vector.broadcast %27 : vector<1x128xf32> to vector<128x128xf32>
    %29 = arith.addf %26, %28 : vector<128x128xf32>
    %cst_19 = arith.constant 0.000000e+00 : f32
    %30 = vector.broadcast %cst_19 : f32 to vector<128x128xf32>
    %31 = arith.cmpf ogt, %29, %30 : vector<128x128xf32>
    %32 = math.exp %29 : vector<128x128xf32>
    %cst_20 = arith.constant 1.000000e+00 : f32
    %33 = vector.broadcast %cst_20 : f32 to vector<128x128xf32>
    %34 = arith.subf %32, %33 : vector<128x128xf32>
    %35 = arith.select %31, %29, %34 : vector<128x128xi1>, vector<128x128xf32>
    %36 = arith.truncf %35 : vector<128x128xf32> to vector<128x128xbf16>
    %c0_21 = arith.constant 0 : index
    %c0_22 = arith.constant 0 : index
    %37 = vector.load %arg8[%c0_21, %c0_22] : memref<128x128xbf16, #tpu.memory_space<vmem>>, vector<128x128xbf16>
    %cst_23 = arith.constant dense<0.000000e+00> : vector<128x128xf32>
    %38 = tpu.matmul %36, %37, %cst_23 {dimension_numbers = #tpu.dot_dimension_numbers<[1], [0], [0], [1], [0, 0, 1, 1], [], []>} : vector<128x128xbf16>, vector<128x128xbf16>, vector<128x128xf32> -> vector<128x128xf32>
    %c0_24 = arith.constant 0 : index
    %c0_25 = arith.constant 0 : index
    %39 = vector.load %arg9[%c0_24, %c0_25] : memref<1x128xf32, #tpu.memory_space<vmem>>, vector<1x128xf32>
    %40 = vector.broadcast %39 : vector<1x128xf32> to vector<128x128xf32>
    %41 = arith.addf %38, %40 : vector<128x128xf32>
    %42 = vector.extract_strided_slice %41 {offsets = [0, 0], sizes = [128, 3], strides = [1, 1]} : vector<128x128xf32> to vector<128x3xf32>
    %c0_26 = arith.constant 0 : index
    %c0_27 = arith.constant 0 : index
    %43 = vector.load %arg10[%c0_26, %c0_27] : memref<128x3xf32, #tpu.memory_space<vmem>>, vector<128x3xf32>
    tpu.vector_store %arg10[%c0_26, %c0_27], %42 {strides = array<i32>} : memref<128x3xf32, #tpu.memory_space<vmem>>, vector<128x3xf32>,
    return
  }
  func.func @transform_0(%arg0: i32) -> (i32, i32) {
    %c0_i32 = arith.constant 0 : i32
    %c0_i32_0 = arith.constant 0 : i32
    return %arg0, %c0_i32 : i32, i32
  }
  func.func @transform_1(%arg0: i32) -> (i32, i32) {
    %c0_i32 = arith.constant 0 : i32
    %c0_i32_0 = arith.constant 0 : i32
    %c0_i32_1 = arith.constant 0 : i32
    return %c0_i32, %c0_i32_0 : i32, i32
  }
  func.func @transform_2(%arg0: i32) -> (i32, i32) {
    %c0_i32 = arith.constant 0 : i32
    %c0_i32_0 = arith.constant 0 : i32
    %c0_i32_1 = arith.constant 0 : i32
    return %c0_i32, %c0_i32_0 : i32, i32
  }
  func.func @transform_3(%arg0: i32) -> (i32, i32) {
    %c0_i32 = arith.constant 0 : i32
    %c0_i32_0 = arith.constant 0 : i32
    %c0_i32_1 = arith.constant 0 : i32
    return %c0_i32, %c0_i32_0 : i32, i32
  }
  func.func @transform_4(%arg0: i32) -> (i32, i32) {
    %c0_i32 = arith.constant 0 : i32
    %c0_i32_0 = arith.constant 0 : i32
    %c0_i32_1 = arith.constant 0 : i32
    return %c0_i32, %c0_i32_0 : i32, i32
  }
  func.func @transform_5(%arg0: i32) -> (i32, i32) {
    %c0_i32 = arith.constant 0 : i32
    %c0_i32_0 = arith.constant 0 : i32
    %c0_i32_1 = arith.constant 0 : i32
    return %c0_i32, %c0_i32_0 : i32, i32
  }
  func.func @transform_6(%arg0: i32) -> (i32, i32) {
    %c0_i32 = arith.constant 0 : i32
    %c0_i32_0 = arith.constant 0 : i32
    %c0_i32_1 = arith.constant 0 : i32
    return %c0_i32, %c0_i32_0 : i32, i32
  }
  func.func @transform_7(%arg0: i32) -> (i32, i32) {
    %c0_i32 = arith.constant 0 : i32
    %c0_i32_0 = arith.constant 0 : i32
    %c0_i32_1 = arith.constant 0 : i32
    return %c0_i32, %c0_i32_0 : i32, i32
  }
  func.func @transform_8(%arg0: i32) -> (i32, i32) {
    %c0_i32 = arith.constant 0 : i32
    %c0_i32_0 = arith.constant 0 : i32
    %c0_i32_1 = arith.constant 0 : i32
    return %c0_i32, %c0_i32_0 : i32, i32
  }
  func.func @transform_9(%arg0: i32) -> (i32, i32) {
    %c0_i32 = arith.constant 0 : i32
    %c0_i32_0 = arith.constant 0 : i32
    return %arg0, %c0_i32 : i32, i32
  }
}

</mosaic_0001>

<bundles_post_ra>
// kernel: surrogate_mlp.1
= control target key start
LH: loop header
LB: loop body
LE: loop exit
PB: predicated region body
PF: predicated region fallthrough
CT: control target
= control target key end

     0   :  { %s1865_s30 = smov 0   ;;  %s2232_s0 = inlined_call_operand.vmem [shape: bf16[256,13], index: 0, kind: input, shape index: {}]   ;;  %s2233_s1 = inlined_call_operand.vmem [shape: bf16[13,128], index: 1, kind: input, shape index: {}]   ;;  %s2234_s2 = inlined_call_operand.vmem [shape: f32[1,128], index: 2, kind: input, shape index: {}]   ;;  %s2235_s3 = inlined_call_operand.vmem [shape: bf16[128,128], index: 3, kind: input, shape index: {}]   ;;  %s2236_s4 = inlined_call_operand.vmem [shape: f32[1,128], index: 4, kind: input, shape index: {}]   ;;  %s2237_s5 = inlined_call_operand.vmem [shape: bf16[128,128], index: 5, kind: input, shape index: {}]   ;;  %s2238_s6 = inlined_call_operand.vmem [shape: f32[1,128], index: 6, kind: input, shape index: {}]   ;;  %s2239_s7 = inlined_call_operand.vmem [shape: bf16[128,128], index: 7, kind: input, shape index: {}]   ;;  %s2240_s8 = inlined_call_operand.vmem [shape: f32[1,128], index: 8, kind: input, shape index: {}]   ;;  %s2241_s9 = inlined_call_operand.vmem [shape: f32[256,3], index: 9, kind: output, shape index: {}]  }
   0x1 LB: > { %s1377_s10 = sadd.s32 4294967295, %s1812_s30   ;;  %p1381_p0 = scmp.ge.s32.totalorder %s1812_s30, 1  ;;  %s1812_s30 = sphi %s1865_s30, %s19_s30  }
   0x2   : > { %p288_p1 = scmp.lt.s32.totalorder %s1812_s30, 3 }
   0x4   : > { %p289_p2 = pnand %p1381_p0, %p288_p1 }
   0x5   : > { %v1677_v0 = vld [vmem:[%s2233_s1] sm:$0x7f] (!%p289_p2)   ;;  %vm432_vm0 = vcmask (!%p289_p2), 1045504   ;;  %vm433_vm1 = vcmask (!%p289_p2), 1046528   ;;  %s1382_s13 = sshll.u32 (!%p289_p2), %s1377_s10, 4  ;;  %v1814_v2 = vmov (!%p289_p2), 65535  }
   0x6   : > { %292 = sbr.rel (%p289_p2) target bundleno = 968 (0x3c8), region = 56  ;;  %v1686_v1 = vld [vmem:[%s2235_s3] sm:$0xff] (!%p289_p2)   ;;  %v434_v3 = vsel (!%p289_p2), %vm432_vm0, 4294967295, %v1814_v2  ;;  %p325_p3 = scmp.lt.s32.totalorder (!%p289_p2), %s1382_s13, 31  ;;  %v1687_v5 = vld [vmem:[%s2235_s3 + $0x8] sm:$0xff] (!%p289_p2)   ;;  %vm407_vm2 = vcmask (!%p289_p2), 105472  }
   0x7   : > { %v435_v4 = vsel (!%p289_p2), %vm433_vm1, %v434_v3, 0  ;;  %1556 = vmatprep.subr.bf16.mxu1 (!%p289_p2), %v1686_v1  ;;  %v1688_v15 = vld [vmem:[%s2235_s3 + $0x10] sm:$0xff] (!%p289_p2)   ;;  %v1689_v16 = vld [vmem:[%s2235_s3 + $0x18] sm:$0xff] (!%p289_p2)   ;;  %v1690_v17 = vld [vmem:[%s2235_s3 + $0x20] sm:$0xff] (!%p289_p2)  }
   0x8   : > { %v437_v6 = vand.u32 (!%p289_p2), %v1677_v0, %v435_v4  ;;  %1557 = vmatpush3.bf16.msra.mxu1 (!%p289_p2), %v1686_v1  ;;  %v1691_v18 = vld [vmem:[%s2235_s3 + $0x28] sm:$0xff] (!%p289_p2)   ;;  %v1692_v19 = vld [vmem:[%s2235_s3 + $0x30] sm:$0xff] (!%p289_p2)   ;;  %v1693_v20 = vld [vmem:[%s2235_s3 + $0x38] sm:$0xff] (!%p289_p2)  }
   0x9   : > { %1558 = vmatprep.subr.bf16.mxu1 (!%p289_p2), %v1687_v5  ;;  %v1694_v21 = vld [vmem:[%s2237_s5] sm:$0xff] (!%p289_p2)   ;;  %v1695_v22 = vld [vmem:[%s2237_s5 + $0x8] sm:$0xff] (!%p289_p2)  }
   0xa   : > { %1538 = vmatprep.subr.bf16.mxu0 (!%p289_p2), %v437_v6  ;;  %v1923_v23 = vld [vmem:[%s2234_s2] ss:$0 sm:$0xff] (!%p289_p2) }
   0xb   : > { %1539 = vmatpush3.bf16.msra.mxu0 (!%p289_p2), %v437_v6 }
   0xc   : > { %1559 = vmatpush3.bf16.msra.mxu1 (!%p289_p2), %v1687_v5  ;;  %1588 = vmatprep.subr.bf16.mxu0 (!%p289_p2), %v1694_v21 }
   0xd   : > { %s2243_s13 = smov (!%p325_p3, %s1382_s13), 31  ;;  %1560 = vmatprep.subr.bf16.mxu1 %v1688_v15 }
   0xe   : > { %s1383_s18 = sshll.u32 %s2243_s13, 2  ;;  %s1385_s15 = sshll.u32 %s2243_s13, 3 }
   0xf   : > { %s328_s21 = scalar_lea.vmem %s2232_s0, %s1383_s18  ;;  %s2195_s20 = scalar_lea.vmem %s2241_s9, %s1385_s15 }
  0x10   : > { %v1678_v7 = vld [vmem:[%s328_s21] sm:$0xff]   ;;  %v1679_v8 = vld [vmem:[%s328_s21 + $0x8] sm:$0xff]   ;;  %v1680_v9 = vld [vmem:[%s328_s21 + $0x10] sm:$0xff]   ;;  %1561 = vmatpush3.bf16.msra.mxu1 %v1688_v15 }
  0x11   : > { %1540 = vmatprep.mubr.msk.bf16.mxu0 %vm407_vm2, %v1678_v7  ;;  %v1681_v10 = vld [vmem:[%s328_s21 + $0x18] sm:$0xff]   ;;  %v1682_v11 = vld [vmem:[%s328_s21 + $0x20] sm:$0xff]   ;;  %v1683_v12 = vld [vmem:[%s328_s21 + $0x28] sm:$0xff]   ;;  %1562 = vmatprep.subr.bf16.mxu1 %v1689_v16 }
  0x12   : > { %1541 = vmatmul.mubr.msk.bf16.vlgmr.msra.gmra.mrb[0].mxu0 %vm407_vm2, %v1679_v8  ;;  %v1684_v13 = vld [vmem:[%s328_s21 + $0x30] sm:$0xff]   ;;  %v1685_v14 = vld [vmem:[%s328_s21 + $0x38] sm:$0xff]  }
  0x13   : > { %1544 = vmatprep.mubr.msk.bf16.mxu0 %vm407_vm2, %v1680_v9  ;;  %1589 = vmatpush3.bf16.msra.mxu0 %v1694_v21 }
  0x14   : > { %1563 = vmatpush3.bf16.msra.mxu1 %v1689_v16  ;;  %1590 = vmatprep.subr.bf16.mxu0 %v1695_v22 }
  0x15   : > { %1564 = vmatprep.subr.bf16.mxu1 %v1690_v17 }
  0x17   : > { %1591 = vmatpush3.bf16.msra.mxu0 %v1695_v22 }
  0x18   : > { %1565 = vmatpush3.bf16.msra.mxu1 %v1690_v17 }
  0x19   : > { %1566 = vmatprep.subr.bf16.mxu1 %v1691_v18 }
  0x1a   : > { %1545 = vmatmul.mubr.msk.bf16.gmra.mrb[4].mxu0 %vm407_vm2, %v1681_v10 }
  0x1b   : > { %1548 = vmatprep.mubr.msk.bf16.mxu0 %vm407_vm2, %v1682_v11 }
  0x1c   : > { %1567 = vmatpush3.bf16.msra.mxu1 %v1691_v18 }
  0x1d   : > { %1568 = vmatprep.subr.bf16.mxu1 %v1692_v19 }
  0x20   : > { %1569 = vmatpush3.bf16.msra.mxu1 %v1692_v19 }
  0x21   : > { %1570 = vmatprep.subr.bf16.mxu1 %v1693_v20 }
  0x22   : > { %1549 = vmatmul.mubr.msk.bf16.gmra.mrb[8].mxu0 %vm407_vm2, %v1683_v12 }
  0x23   : > { %1552 = vmatprep.mubr.msk.bf16.mxu0 %vm407_vm2, %v1684_v13 }
  0x24   : > { %1571 = vmatpush3.bf16.msra.mxu1 %v1693_v20 }
  0x2a   : > { %1553 = vmatmul.mubr.msk.bf16.gmra.mrb[12].mxu0 %vm407_vm2, %v1685_v14 }
  0xe5   : > { %v1542_v24 = vpop.f32.mrb[0].mxu0 }
  0xe6   : > { %v1926_v25 = vadd.f32 %v1542_v24, %v1923_v23  ;;  %v473_v26 = vpop.f32.mrb[1].mxu0 }
  0xe7   : > { %v474_v27 = vadd.f32 %v1923_v23, %v473_v26  ;;  %v1543_v28 = vpop.f32.mrb[2].mxu0 }
  0xe8   : > { %v556_v29 = vmul.f32 1.442695, %v1926_v25  ;;  %v485_v30 = vadd.f32 %v1543_v28, %v1923_v23  ;;  %v476_v31 = vpop.f32.mrb[3].mxu0  ;;  %vm538_vm3 = vcmp.gt.f32.partialorder %v1926_v25, 0.0 }
  0xe9   : > { %v552_v32 = vmul.f32 1.442695, %v474_v27  ;;  %v477_v33 = vadd.f32 %v1923_v23, %v476_v31  ;;  %vm536_vm4 = vcmp.gt.f32.partialorder %v474_v27, 0.0 }
  0xea   : > { %1710 = vpow2.f32 %v556_v29  ;;  %v558_v34 = vmul.f32 1.442695, %v485_v30  ;;  %vm539_vm6 = vcmp.gt.f32.partialorder %v485_v30, 0.0 }
  0xeb   : > { %1712 = vpow2.f32 %v552_v32  ;;  %v554_v35 = vmul.f32 1.442695, %v477_v33  ;;  %vm537_vm5 = vcmp.gt.f32.partialorder %v477_v33, 0.0 }
  0xec   : > { %1714 = vpow2.f32 %v558_v34 }
  0xed   : > { %1716 = vpow2.f32 %v554_v35  ;;  %v1546_v36 = vpop.f32.mrb[4].mxu0 }
  0xee   : > { %v1933_v37 = vadd.f32 %v1546_v36, %v1923_v23  ;;  %v489_v38 = vpop.f32.mrb[5].mxu0 }
  0xef   : > { %v1936_v39 = vadd.f32 %v1923_v23, %v489_v38  ;;  %v1547_v40 = vpop.f32.mrb[6].mxu0 }
  0xf0   : > { %v564_v41 = vmul.f32 1.442695, %v1933_v37  ;;  %v1940_v42 = vadd.f32 %v1547_v40, %v1923_v23  ;;  %v492_v43 = vpop.f32.mrb[7].mxu0  ;;  %vm542_vm7 = vcmp.gt.f32.partialorder %v1933_v37, 0.0 }
  0xf1   : > { %v560_v44 = vmul.f32 1.442695, %v1936_v39  ;;  %v1944_v45 = vadd.f32 %v1923_v23, %v492_v43  ;;  %vm540_vm8 = vcmp.gt.f32.partialorder %v1936_v39, 0.0 }
  0xf2   : > { %1718 = vpow2.f32 %v564_v41  ;;  %v566_v46 = vmul.f32 1.442695, %v1940_v42  ;;  %vm543_vm10 = vcmp.gt.f32.partialorder %v1940_v42, 0.0 }
  0xf3   : > { %1720 = vpow2.f32 %v560_v44  ;;  %v562_v47 = vmul.f32 1.442695, %v1944_v45  ;;  %vm541_vm9 = vcmp.gt.f32.partialorder %v1944_v45, 0.0 }
  0xf4   : > { %v1711_v48 = vpop.eup %1710  ;;  %1722 = vpow2.f32 %v566_v46 }
  0xf5   : > { %v1713_v49 = vpop.eup %1712  ;;  %1724 = vpow2.f32 %v562_v47  ;;  %v1550_v50 = vpop.f32.mrb[8].mxu0  ;;  %v1406_v56 = vadd.f32 -1.0, %v1711_v48 }
  0xf6   : > { %v1715_v51 = vpop.eup %1714  ;;  %v1949_v52 = vadd.f32 %v1550_v50, %v1923_v23  ;;  %v505_v53 = vpop.f32.mrb[9].mxu0  ;;  %v1404_v54 = vadd.f32 -1.0, %v1713_v49 }
  0xf7   : > { %v1717_v55 = vpop.eup %1716  ;;  %v1953_v57 = vadd.f32 %v1923_v23, %v505_v53  ;;  %v1551_v58 = vpop.f32.mrb[10].mxu0  ;;  %v1407_v59 = vadd.f32 -1.0, %v1715_v51  ;;  %v602_v8 = vsel %vm538_vm3, %v1926_v25, %v1406_v56 }
  0xf8   : > { %v572_v60 = vmul.f32 1.442695, %v1949_v52  ;;  %v1957_v61 = vadd.f32 %v1551_v58, %v1923_v23  ;;  %v508_v62 = vpop.f32.mrb[11].mxu0  ;;  %v1405_v63 = vadd.f32 -1.0, %v1717_v55  ;;  %v600_v3 = vsel %vm536_vm4, %v474_v27, %v1404_v54 }
  0xf9   : > { %v568_v0 = vmul.f32 1.442695, %v1953_v57  ;;  %v1961_v1 = vadd.f32 %v1923_v23, %v508_v62  ;;  %v603_v9 = vsel %vm539_vm6, %v485_v30, %v1407_v59  ;;  %vm546_vm11 = vcmp.gt.f32.partialorder %v1949_v52, 0.0 }
  0xfa   : > { %1726 = vpow2.f32 %v572_v60  ;;  %v574_v2 = vmul.f32 1.442695, %v1957_v61  ;;  %v601_v4 = vsel %vm537_vm5, %v477_v33, %v1405_v63  ;;  %v617_v12 = vpack.c.bf16 %v603_v9, %v602_v8  ;;  %v2031_v8 = vld [vmem:[%s2236_s4] ss:$0 sm:$0xff] }
  0xfb   : > { %1728 = vpow2.f32 %v568_v0  ;;  %v570_v5 = vmul.f32 1.442695, %v1961_v1  ;;  %v616_v6 = vpack.c.bf16 %v601_v4, %v600_v3  ;;  %vm547_vm12 = vcmp.gt.f32.partialorder %v1957_v61, 0.0  ;;  %v1696_v0 = vld [vmem:[%s2237_s5 + $0x10] sm:$0xff]   ;;  %v1699_v3 = vld [vmem:[%s2237_s5 + $0x28] sm:$0xff]  }
  0xfc   : > { %v1719_v7 = vpop.eup %1718  ;;  %1730 = vpow2.f32 %v574_v2  ;;  %vm544_vm13 = vcmp.gt.f32.partialorder %v1953_v57, 0.0  ;;  %vm545_vm14 = vcmp.gt.f32.partialorder %v1961_v1, 0.0  ;;  %1592 = vmatprep.subr.bf16.mxu0 %v1696_v0  ;;  %v1698_v2 = vld [vmem:[%s2237_s5 + $0x20] sm:$0xff]   ;;  %v1700_v4 = vld [vmem:[%s2237_s5 + $0x30] sm:$0xff]  }
  0xfd   : > { %v1721_v10 = vpop.eup %1720  ;;  %1732 = vpow2.f32 %v570_v5  ;;  %v1554_v11 = vpop.f32.mrb[12].mxu0  ;;  %1572 = vmatprep.mubr.bf16.mxu1 %v616_v6  ;;  %v1410_v18 = vadd.f32 -1.0, %v1719_v7  ;;  %1593 = vmatpush3.bf16.msra.mxu0 %v1696_v0  ;;  %v1701_v5 = vld [vmem:[%s2237_s5 + $0x38] sm:$0xff]   ;;  %v2016_v6 = vld [vmem:[%s2239_s7] sm:$0xff]   ;;  %v2022_v7 = vld [vmem:[%s2239_s7 + $0x8] sm:$0xff]  }
  0xfe   : > { %v1723_v13 = vpop.eup %1722  ;;  %v1408_v14 = vadd.f32 -1.0, %v1721_v10  ;;  %v1969_v15 = vadd.f32 %v1554_v11, %v1923_v23  ;;  %v521_v16 = vpop.f32.mrb[13].mxu0  ;;  %1573 = vmatmul.mubr.bf16.vlgmr.msra.gmra.mrb[0].mxu1 %v617_v12  ;;  %1652 = vmatprep.subr.bf16.mxu1 %v2016_v6 }
  0xff   : > { %v1725_v17 = vpop.eup %1724  ;;  %v522_v19 = vadd.f32 %v1923_v23, %v521_v16  ;;  %v1555_v20 = vpop.f32.mrb[14].mxu0  ;;  %v1411_v21 = vadd.f32 -1.0, %v1723_v13  ;;  %v606_v35 = vsel %vm542_vm7, %v1933_v37, %v1410_v18  ;;  %1660 = vmatpush3.bf16.msra.mxu1 %v2016_v6 }
 0x100   : > { %v1409_v22 = vadd.f32 -1.0, %v1725_v17  ;;  %v580_v24 = vmul.f32 1.442695, %v1969_v15  ;;  %v533_v25 = vadd.f32 %v1555_v20, %v1923_v23  ;;  %v524_v26 = vpop.f32.mrb[15].mxu0  ;;  %v604_v30 = vsel %vm540_vm8, %v1936_v39, %v1408_v14  ;;  %1653 = vmatprep.subr.bf16.mxu1 %v2022_v7 }
 0x101   : > { %v576_v27 = vmul.f32 1.442695, %v522_v19  ;;  %v525_v28 = vadd.f32 %v1923_v23, %v524_v26  ;;  %v607_v36 = vsel %vm543_vm10, %v1940_v42, %v1411_v21  ;;  %vm550_vm15 = vcmp.gt.f32.partialorder %v1969_v15, 0.0 }
 0x102   : > { %1734 = vpow2.f32 %v580_v24  ;;  %v582_v29 = vmul.f32 1.442695, %v533_v25  ;;  %v605_v31 = vsel %vm541_vm9, %v1944_v45, %v1409_v22  ;;  %v619_v39 = vpack.c.bf16 %v607_v36, %v606_v35 }
 0x103   : > { %1736 = vpow2.f32 %v576_v27  ;;  %v578_v32 = vmul.f32 1.442695, %v525_v28  ;;  %v618_v33 = vpack.c.bf16 %v605_v31, %v604_v30  ;;  %vm551_vm0 = vcmp.gt.f32.partialorder %v533_v25, 0.0  ;;  %1661 = vmatpush3.bf16.msra.mxu1 %v2022_v7 }
 0x104   : > { %v1727_v34 = vpop.eup %1726  ;;  %1738 = vpow2.f32 %v582_v29  ;;  %vm548_vm1 = vcmp.gt.f32.partialorder %v522_v19, 0.0  ;;  %vm549_vm2 = vcmp.gt.f32.partialorder %v525_v28, 0.0 }
 0x105   : > { %v1729_v23 = vpop.eup %1728  ;;  %v1414_v38 = vadd.f32 -1.0, %v1727_v34  ;;  %1740 = vpow2.f32 %v578_v32  ;;  %1576 = vmatprep.mubr.bf16.mxu1 %v618_v33 }
 0x106   : > { %v1731_v40 = vpop.eup %1730  ;;  %v1412_v41 = vadd.f32 -1.0, %v1729_v23  ;;  %1577 = vmatmul.mubr.bf16.gmra.mrb[4].mxu1 %v619_v39 }
 0x107   : > { %v1733_v43 = vpop.eup %1732  ;;  %v1415_v44 = vadd.f32 -1.0, %v1731_v40  ;;  %v610_v37 = vsel %vm546_vm11, %v1949_v52, %v1414_v38 }
 0x108   : > { %v1413_v45 = vadd.f32 -1.0, %v1733_v43  ;;  %v608_v46 = vsel %vm544_vm13, %v1953_v57, %v1412_v41 }
 0x109   : > { %v611_v42 = vsel %vm547_vm12, %v1957_v61, %v1415_v44 }
 0x10a   : > { %v609_v47 = vsel %vm545_vm14, %v1961_v1, %v1413_v45  ;;  %v621_v48 = vpack.c.bf16 %v611_v42, %v610_v37  ;;  %v1697_v1 = vld [vmem:[%s2237_s5 + $0x18] sm:$0xff]  }
 0x10b   : > { %v620_v49 = vpack.c.bf16 %v609_v47, %v608_v46  ;;  %1594 = vmatprep.subr.bf16.mxu0 %v1697_v1 }
 0x10c   : > { %v1735_v50 = vpop.eup %1734  ;;  %1595 = vmatpush3.bf16.msra.mxu0 %v1697_v1 }
 0x10d   : > { %v1737_v51 = vpop.eup %1736  ;;  %v1418_v53 = vadd.f32 -1.0, %v1735_v50  ;;  %1580 = vmatprep.mubr.bf16.mxu1 %v620_v49  ;;  %1596 = vmatprep.subr.bf16.mxu0 %v1698_v2 }
 0x10e   : > { %v1739_v54 = vpop.eup %1738  ;;  %v1416_v55 = vadd.f32 -1.0, %v1737_v51  ;;  %1581 = vmatmul.mubr.bf16.gmra.mrb[8].mxu1 %v621_v48 }
 0x10f   : > { %v1741_v56 = vpop.eup %1740  ;;  %v1419_v58 = vadd.f32 -1.0, %v1739_v54  ;;  %v614_v57 = vsel %vm550_vm15, %v1969_v15, %v1418_v53 }
 0x110   : > { %v1417_v52 = vadd.f32 -1.0, %v1741_v56  ;;  %v612_v60 = vsel %vm548_vm1, %v522_v19, %v1416_v55  ;;  %1597 = vmatpush3.bf16.msra.mxu0 %v1698_v2 }
 0x111   : > { %v615_v59 = vsel %vm551_vm0, %v533_v25, %v1419_v58  ;;  %1598 = vmatprep.subr.bf16.mxu0 %v1699_v3 }
 0x112   : > { %v613_v61 = vsel %vm549_vm2, %v525_v28, %v1417_v52  ;;  %v623_v62 = vpack.c.bf16 %v615_v59, %v614_v57 }
 0x113   : > { %v622_v63 = vpack.c.bf16 %v613_v61, %v612_v60 }
 0x114   : > { %1599 = vmatpush3.bf16.msra.mxu0 %v1699_v3 }
 0x115   : > { %1584 = vmatprep.mubr.bf16.mxu1 %v622_v63  ;;  %1600 = vmatprep.subr.bf16.mxu0 %v1700_v4 }
 0x116   : > { %1585 = vmatmul.mubr.bf16.gmra.mrb[12].mxu1 %v623_v62 }
 0x118   : > { %1601 = vmatpush3.bf16.msra.mxu0 %v1700_v4 }
 0x119   : > { %1602 = vmatprep.subr.bf16.mxu0 %v1701_v5 }
 0x11c   : > { %1603 = vmatpush3.bf16.msra.mxu0 %v1701_v5 }
 0x11d   : > { %1620 = vmatprep.subr.bf16.mxu0 %v2016_v6 }
 0x1d1   : > { %v1574_v9 = vpop.f32.mrb[0].mxu1 }
 0x1d2   : > { %v738_v10 = vadd.f32 %v1574_v9, %v2031_v8  ;;  %v729_v11 = vpop.f32.mrb[1].mxu1 }
 0x1d3   : > { %v730_v12 = vadd.f32 %v2031_v8, %v729_v11  ;;  %v1575_v13 = vpop.f32.mrb[2].mxu1 }
 0x1d4   : > { %v812_v14 = vmul.f32 1.442695, %v738_v10  ;;  %v741_v15 = vadd.f32 %v1575_v13, %v2031_v8  ;;  %v732_v16 = vpop.f32.mrb[3].mxu1  ;;  %vm794_vm3 = vcmp.gt.f32.partialorder %v738_v10, 0.0 }
 0x1d5   : > { %v808_v17 = vmul.f32 1.442695, %v730_v12  ;;  %v733_v18 = vadd.f32 %v2031_v8, %v732_v16  ;;  %vm792_vm5 = vcmp.gt.f32.partialorder %v730_v12, 0.0 }
 0x1d6   : > { %1742 = vpow2.f32 %v812_v14  ;;  %v814_v19 = vmul.f32 1.442695, %v741_v15  ;;  %vm795_vm4 = vcmp.gt.f32.partialorder %v741_v15, 0.0 }
 0x1d7   : > { %1744 = vpow2.f32 %v808_v17  ;;  %v810_v20 = vmul.f32 1.442695, %v733_v18  ;;  %vm793_vm6 = vcmp.gt.f32.partialorder %v733_v18, 0.0 }
 0x1d8   : > { %1746 = vpow2.f32 %v814_v19 }
 0x1d9   : > { %1748 = vpow2.f32 %v810_v20  ;;  %v1578_v21 = vpop.f32.mrb[4].mxu1 }
 0x1da   : > { %v2038_v22 = vadd.f32 %v1578_v21, %v2031_v8  ;;  %v745_v24 = vpop.f32.mrb[5].mxu1 }
 0x1db   : > { %v2041_v25 = vadd.f32 %v2031_v8, %v745_v24  ;;  %v1579_v26 = vpop.f32.mrb[6].mxu1 }
 0x1dc   : > { %v820_v27 = vmul.f32 1.442695, %v2038_v22  ;;  %v2045_v28 = vadd.f32 %v1579_v26, %v2031_v8  ;;  %v748_v29 = vpop.f32.mrb[7].mxu1  ;;  %vm798_vm7 = vcmp.gt.f32.partialorder %v2038_v22, 0.0 }
 0x1dd   : > { %v816_v30 = vmul.f32 1.442695, %v2041_v25  ;;  %v2049_v31 = vadd.f32 %v2031_v8, %v748_v29  ;;  %vm796_vm8 = vcmp.gt.f32.partialorder %v2041_v25, 0.0 }
 0x1de   : > { %1750 = vpow2.f32 %v820_v27  ;;  %v822_v32 = vmul.f32 1.442695, %v2045_v28  ;;  %vm799_vm10 = vcmp.gt.f32.partialorder %v2045_v28, 0.0 }
 0x1df   : > { %1752 = vpow2.f32 %v816_v30  ;;  %v818_v33 = vmul.f32 1.442695, %v2049_v31  ;;  %vm797_vm9 = vcmp.gt.f32.partialorder %v2049_v31, 0.0 }
 0x1e0   : > { %v1743_v34 = vpop.eup %1742  ;;  %1754 = vpow2.f32 %v822_v32 }
 0x1e1   : > { %v1745_v35 = vpop.eup %1744  ;;  %v1431_v36 = vadd.f32 -1.0, %v1743_v34  ;;  %1756 = vpow2.f32 %v818_v33  ;;  %v1582_v23 = vpop.f32.mrb[8].mxu1 }
 0x1e2   : > { %v1747_v38 = vpop.eup %1746  ;;  %v2054_v39 = vadd.f32 %v1582_v23, %v2031_v8  ;;  %v761_v40 = vpop.f32.mrb[9].mxu1  ;;  %v1429_v37 = vadd.f32 -1.0, %v1745_v35 }
 0x1e3   : > { %v1749_v41 = vpop.eup %1748  ;;  %v1432_v43 = vadd.f32 -1.0, %v1747_v38  ;;  %v2057_v44 = vadd.f32 %v2031_v8, %v761_v40  ;;  %v1583_v45 = vpop.f32.mrb[10].mxu1  ;;  %v858_v49 = vsel %vm794_vm3, %v738_v10, %v1431_v36 }
 0x1e4   : > { %v1430_v42 = vadd.f32 -1.0, %v1749_v41  ;;  %v828_v46 = vmul.f32 1.442695, %v2054_v39  ;;  %v2061_v47 = vadd.f32 %v1583_v45, %v2031_v8  ;;  %v764_v48 = vpop.f32.mrb[11].mxu1  ;;  %v856_v52 = vsel %vm792_vm5, %v730_v12, %v1429_v37 }
 0x1e5   : > { %v859_v50 = vsel %vm795_vm4, %v741_v15, %v1432_v43  ;;  %v824_v51 = vmul.f32 1.442695, %v2057_v44  ;;  %v2065_v53 = vadd.f32 %v2031_v8, %v764_v48  ;;  %vm802_vm11 = vcmp.gt.f32.partialorder %v2054_v39, 0.0 }
 0x1e6   : > { %v873_v54 = vpack.c.bf16 %v859_v50, %v858_v49  ;;  %1758 = vpow2.f32 %v828_v46  ;;  %v830_v55 = vmul.f32 1.442695, %v2061_v47  ;;  %v857_v57 = vsel %vm793_vm6, %v733_v18, %v1430_v42  ;;  %v1704_v49 = vld [vmem:[%s2239_s7 + $0x10] sm:$0xff]   ;;  %v1705_v50 = vld [vmem:[%s2239_s7 + $0x18] sm:$0xff]  }
 0x1e7   : > { %1760 = vpow2.f32 %v824_v51  ;;  %v826_v56 = vmul.f32 1.442695, %v2065_v53  ;;  %v872_v61 = vpack.c.bf16 %v857_v57, %v856_v52  ;;  %vm803_vm12 = vcmp.gt.f32.partialorder %v2061_v47, 0.0  ;;  %1654 = vmatprep.subr.bf16.mxu1 %v1704_v49  ;;  %v1706_v51 = vld [vmem:[%s2239_s7 + $0x20] sm:$0xff]  }
 0x1e8   : > { %v1751_v58 = vpop.eup %1750  ;;  %1762 = vpow2.f32 %v830_v55  ;;  %vm800_vm13 = vcmp.gt.f32.partialorder %v2057_v44, 0.0  ;;  %vm801_vm14 = vcmp.gt.f32.partialorder %v2065_v53, 0.0  ;;  %1662 = vmatpush3.bf16.msra.mxu1 %v1704_v49  ;;  %v1709_v55 = vld [vmem:[%s2239_s7 + $0x38] sm:$0xff]  }
 0x1e9   : > { %v1753_v59 = vpop.eup %1752  ;;  %1764 = vpow2.f32 %v826_v56  ;;  %v1586_v60 = vpop.f32.mrb[12].mxu1  ;;  %v1435_v3 = vadd.f32 -1.0, %v1751_v58  ;;  %1604 = vmatprep.mubr.bf16.mxu0 %v872_v61  ;;  %1655 = vmatprep.subr.bf16.mxu1 %v1705_v50  ;;  %v2125_v56 = vld [vmem:[%s2238_s6] ss:$0 sm:$0xff] }
 0x1ea   : > { %v1755_v62 = vpop.eup %1754  ;;  %v1433_v63 = vadd.f32 -1.0, %v1753_v59  ;;  %v2070_v0 = vadd.f32 %v1586_v60, %v2031_v8  ;;  %v777_v1 = vpop.f32.mrb[13].mxu1  ;;  %1605 = vmatmul.mubr.bf16.vlgmr.msra.gmra.mrb[16].mxu0 %v873_v54  ;;  %v1708_v54 = vld [vmem:[%s2239_s7 + $0x30] sm:$0xff]  }
 0x1eb   : > { %v1757_v2 = vpop.eup %1756  ;;  %v2074_v4 = vadd.f32 %v2031_v8, %v777_v1  ;;  %v1587_v5 = vpop.f32.mrb[14].mxu1  ;;  %v1436_v9 = vadd.f32 -1.0, %v1755_v62  ;;  %1621 = vmatpush3.bf16.msra.mxu0 %v2016_v6 }
 0x1ec   : > { %v1434_v10 = vadd.f32 -1.0, %v1757_v2  ;;  %v836_v11 = vmul.f32 1.442695, %v2070_v0  ;;  %v789_v12 = vadd.f32 %v1587_v5, %v2031_v8  ;;  %v780_v13 = vpop.f32.mrb[15].mxu1  ;;  %v860_v17 = vsel %vm796_vm8, %v2041_v25, %v1433_v63  ;;  %1622 = vmatprep.subr.bf16.mxu0 %v2022_v7  ;;  %1663 = vmatpush3.bf16.msra.mxu1 %v1705_v50 }
 0x1ed   : > { %v832_v14 = vmul.f32 1.442695, %v2074_v4  ;;  %v781_v15 = vadd.f32 %v2031_v8, %v780_v13  ;;  %v862_v8 = vsel %vm798_vm7, %v2038_v22, %v1435_v3  ;;  %v863_v6 = vsel %vm799_vm10, %v2045_v28, %v1436_v9  ;;  %1656 = vmatprep.subr.bf16.mxu1 %v1706_v51 }
 0x1ee   : > { %1766 = vpow2.f32 %v836_v11  ;;  %v838_v16 = vmul.f32 1.442695, %v789_v12  ;;  %v861_v18 = vsel %vm797_vm9, %v2049_v31, %v1434_v10  ;;  %v875_v25 = vpack.c.bf16 %v863_v6, %v862_v8 }
 0x1ef   : > { %1768 = vpow2.f32 %v832_v14  ;;  %v834_v19 = vmul.f32 1.442695, %v781_v15  ;;  %v874_v20 = vpack.c.bf16 %v861_v18, %v860_v17  ;;  %1623 = vmatpush3.bf16.msra.mxu0 %v2022_v7  ;;  %vm806_vm15 = vcmp.gt.f32.partialorder %v2070_v0, 0.0 }
 0x1f0   : > { %v1759_v21 = vpop.eup %1758  ;;  %1770 = vpow2.f32 %v838_v16  ;;  %vm807_vm0 = vcmp.gt.f32.partialorder %v789_v12, 0.0  ;;  %vm804_vm1 = vcmp.gt.f32.partialorder %v2074_v4, 0.0  ;;  %vm805_vm2 = vcmp.gt.f32.partialorder %v781_v15, 0.0  ;;  %1624 = vmatprep.subr.bf16.mxu0 %v1704_v49  ;;  %1664 = vmatpush3.bf16.msra.mxu1 %v1706_v51 }
 0x1f1   : > { %v1761_v24 = vpop.eup %1760  ;;  %v1439_v26 = vadd.f32 -1.0, %v1759_v21  ;;  %1772 = vpow2.f32 %v834_v19  ;;  %1608 = vmatprep.mubr.bf16.mxu0 %v874_v20 }
 0x1f2   : > { %v1763_v27 = vpop.eup %1762  ;;  %v1437_v29 = vadd.f32 -1.0, %v1761_v24  ;;  %1609 = vmatmul.mubr.bf16.gmra.mrb[20].mxu0 %v875_v25 }
 0x1f3   : > { %v1765_v30 = vpop.eup %1764  ;;  %v1440_v31 = vadd.f32 -1.0, %v1763_v27  ;;  %v866_v22 = vsel %vm802_vm11, %v2054_v39, %v1439_v26  ;;  %1625 = vmatpush3.bf16.msra.mxu0 %v1704_v49 }
 0x1f4   : > { %v1438_v32 = vadd.f32 -1.0, %v1765_v30  ;;  %v864_v7 = vsel %vm800_vm13, %v2057_v44, %v1437_v29  ;;  %1626 = vmatprep.subr.bf16.mxu0 %v1705_v50 }
 0x1f5   : > { %v867_v28 = vsel %vm803_vm12, %v2061_v47, %v1440_v31 }
 0x1f6   : > { %v865_v33 = vsel %vm801_vm14, %v2065_v53, %v1438_v32  ;;  %v877_v34 = vpack.c.bf16 %v867_v28, %v866_v22  ;;  %v1707_v53 = vld [vmem:[%s2239_s7 + $0x28] sm:$0xff]  }
 0x1f7   : > { %v876_v35 = vpack.c.bf16 %v865_v33, %v864_v7  ;;  %1627 = vmatpush3.bf16.msra.mxu0 %v1705_v50  ;;  %1657 = vmatprep.subr.bf16.mxu1 %v1707_v53 }
 0x1f8   : > { %v1767_v36 = vpop.eup %1766  ;;  %1628 = vmatprep.subr.bf16.mxu0 %v1706_v51  ;;  %1665 = vmatpush3.bf16.msra.mxu1 %v1707_v53 }
 0x1f9   : > { %v1769_v23 = vpop.eup %1768  ;;  %v1443_v38 = vadd.f32 -1.0, %v1767_v36  ;;  %1612 = vmatprep.mubr.bf16.mxu0 %v876_v35  ;;  %1658 = vmatprep.subr.bf16.mxu1 %v1708_v54 }
 0x1fa   : > { %v1771_v40 = vpop.eup %1770  ;;  %v1441_v41 = vadd.f32 -1.0, %v1769_v23  ;;  %1613 = vmatmul.mubr.bf16.gmra.mrb[24].mxu0 %v877_v34 }
 0x1fb   : > { %v1773_v43 = vpop.eup %1772  ;;  %v1444_v45 = vadd.f32 -1.0, %v1771_v40  ;;  %v870_v44 = vsel %vm806_vm15, %v2070_v0, %v1443_v38  ;;  %1629 = vmatpush3.bf16.msra.mxu0 %v1706_v51 }
 0x1fc   : > { %v1442_v39 = vadd.f32 -1.0, %v1773_v43  ;;  %v868_v42 = vsel %vm804_vm1, %v2074_v4, %v1441_v41  ;;  %1630 = vmatprep.subr.bf16.mxu0 %v1707_v53  ;;  %1666 = vmatpush3.bf16.msra.mxu1 %v1708_v54 }
 0x1fd   : > { %v871_v37 = vsel %vm807_vm0, %v789_v12, %v1444_v45  ;;  %1659 = vmatprep.subr.bf16.mxu1 %v1709_v55 }
 0x1fe   : > { %v869_v46 = vsel %vm805_vm2, %v781_v15, %v1442_v39  ;;  %v879_v47 = vpack.c.bf16 %v871_v37, %v870_v44 }
 0x1ff   : > { %v878_v48 = vpack.c.bf16 %v869_v46, %v868_v42  ;;  %1631 = vmatpush3.bf16.msra.mxu0 %v1707_v53 }
 0x200   : > { %1632 = vmatprep.subr.bf16.mxu0 %v1708_v54  ;;  %1667 = vmatpush3.bf16.msra.mxu1 %v1709_v55 }
 0x201   : > { %1616 = vmatprep.mubr.bf16.mxu0 %v878_v48 }
 0x202   : > { %1617 = vmatmul.mubr.bf16.gmra.mrb[28].mxu0 %v879_v47 }
 0x203   : > { %1633 = vmatpush3.bf16.msra.mxu0 %v1708_v54 }
 0x204   : > { %1634 = vmatprep.subr.bf16.mxu0 %v1709_v55 }
 0x207   : > { %1635 = vmatpush3.bf16.msra.mxu0 %v1709_v55 }
 0x2bd   : > { %v1606_v58 = vpop.f32.mrb[16].mxu0 }
 0x2be   : > { %v994_v52 = vadd.f32 %v1606_v58, %v2125_v56  ;;  %v985_v57 = vpop.f32.mrb[17].mxu0 }
 0x2bf   : > { %v986_v59 = vadd.f32 %v2125_v56, %v985_v57  ;;  %v1607_v60 = vpop.f32.mrb[18].mxu0 }
 0x2c0   : > { %v1068_v61 = vmul.f32 1.442695, %v994_v52  ;;  %v997_v62 = vadd.f32 %v1607_v60, %v2125_v56  ;;  %v988_v63 = vpop.f32.mrb[19].mxu0  ;;  %vm1050_vm3 = vcmp.gt.f32.partialorder %v994_v52, 0.0 }
 0x2c1   : > { %v1064_v0 = vmul.f32 1.442695, %v986_v59  ;;  %v989_v1 = vadd.f32 %v2125_v56, %v988_v63  ;;  %vm1048_vm5 = vcmp.gt.f32.partialorder %v986_v59, 0.0 }
 0x2c2   : > { %1774 = vpow2.f32 %v1068_v61  ;;  %v1070_v2 = vmul.f32 1.442695, %v997_v62  ;;  %vm1051_vm4 = vcmp.gt.f32.partialorder %v997_v62, 0.0 }
 0x2c3   : > { %1776 = vpow2.f32 %v1064_v0  ;;  %v1066_v3 = vmul.f32 1.442695, %v989_v1  ;;  %vm1049_vm6 = vcmp.gt.f32.partialorder %v989_v1, 0.0 }
 0x2c4   : > { %1778 = vpow2.f32 %v1070_v2 }
 0x2c5   : > { %1780 = vpow2.f32 %v1066_v3  ;;  %v1610_v4 = vpop.f32.mrb[20].mxu0 }
 0x2c6   : > { %v2132_v5 = vadd.f32 %v1610_v4, %v2125_v56  ;;  %v1001_v9 = vpop.f32.mrb[21].mxu0 }
 0x2c7   : > { %v2135_v10 = vadd.f32 %v2125_v56, %v1001_v9  ;;  %v1611_v11 = vpop.f32.mrb[22].mxu0 }
 0x2c8   : > { %v1076_v12 = vmul.f32 1.442695, %v2132_v5  ;;  %v2139_v13 = vadd.f32 %v1611_v11, %v2125_v56  ;;  %v1004_v14 = vpop.f32.mrb[23].mxu0  ;;  %vm1054_vm7 = vcmp.gt.f32.partialorder %v2132_v5, 0.0 }
 0x2c9   : > { %v1072_v15 = vmul.f32 1.442695, %v2135_v10  ;;  %v2143_v16 = vadd.f32 %v2125_v56, %v1004_v14  ;;  %vm1052_vm9 = vcmp.gt.f32.partialorder %v2135_v10, 0.0 }
 0x2ca   : > { %1782 = vpow2.f32 %v1076_v12  ;;  %v1078_v17 = vmul.f32 1.442695, %v2139_v13  ;;  %vm1055_vm8 = vcmp.gt.f32.partialorder %v2139_v13, 0.0 }
 0x2cb   : > { %1784 = vpow2.f32 %v1072_v15  ;;  %v1074_v18 = vmul.f32 1.442695, %v2143_v16  ;;  %vm1053_vm10 = vcmp.gt.f32.partialorder %v2143_v16, 0.0 }
 0x2cc   : > { %v1775_v19 = vpop.eup %1774  ;;  %1786 = vpow2.f32 %v1078_v17 }
 0x2cd   : > { %v1777_v20 = vpop.eup %1776  ;;  %v1456_v21 = vadd.f32 -1.0, %v1775_v19  ;;  %1788 = vpow2.f32 %v1074_v18  ;;  %v1614_v8 = vpop.f32.mrb[24].mxu0 }
 0x2ce   : > { %v1779_v6 = vpop.eup %1778  ;;  %v2148_v24 = vadd.f32 %v1614_v8, %v2125_v56  ;;  %v1017_v26 = vpop.f32.mrb[25].mxu0  ;;  %v1454_v31 = vadd.f32 -1.0, %v1777_v20 }
 0x2cf   : > { %v1781_v25 = vpop.eup %1780  ;;  %v1457_v27 = vadd.f32 -1.0, %v1779_v6  ;;  %v2151_v29 = vadd.f32 %v2125_v56, %v1017_v26  ;;  %v1615_v30 = vpop.f32.mrb[26].mxu0  ;;  %v1114_v33 = vsel %vm1050_vm3, %v994_v52, %v1456_v21  ;;  %vm1304_vm3 = vcmask 23552  }
 0x2d0   : > { %v1455_v32 = vadd.f32 -1.0, %v1781_v25  ;;  %v1084_v22 = vmul.f32 1.442695, %v2148_v24  ;;  %v2155_v28 = vadd.f32 %v1615_v30, %v2125_v56  ;;  %v1020_v7 = vpop.f32.mrb[27].mxu0  ;;  %v1112_v43 = vsel %vm1048_vm5, %v986_v59, %v1454_v31 }
 0x2d1   : > { %v1115_v34 = vsel %vm1051_vm4, %v997_v62, %v1457_v27  ;;  %v1080_v35 = vmul.f32 1.442695, %v2151_v29  ;;  %v2159_v36 = vadd.f32 %v2125_v56, %v1020_v7  ;;  %vm1058_vm11 = vcmp.gt.f32.partialorder %v2148_v24, 0.0 }
 0x2d2   : > { %v1129_v23 = vpack.c.bf16 %v1115_v34, %v1114_v33  ;;  %1790 = vpow2.f32 %v1084_v22  ;;  %v1086_v38 = vmul.f32 1.442695, %v2155_v28  ;;  %v1113_v45 = vsel %vm1049_vm6, %v989_v1, %v1455_v32  ;;  %v1470_v33 = vld [vmem:[%s2240_s8] ss:$0 sm:$0xff] }
 0x2d3   : > { %1792 = vpow2.f32 %v1080_v35  ;;  %v1082_v40 = vmul.f32 1.442695, %v2159_v36  ;;  %v1128_v42 = vpack.c.bf16 %v1113_v45, %v1112_v43  ;;  %vm1059_vm12 = vcmp.gt.f32.partialorder %v2155_v28, 0.0 }
 0x2d4   : > { %v1783_v41 = vpop.eup %1782  ;;  %1794 = vpow2.f32 %v1086_v38  ;;  %vm1056_vm13 = vcmp.gt.f32.partialorder %v2151_v29, 0.0  ;;  %vm1057_vm14 = vcmp.gt.f32.partialorder %v2159_v36, 0.0 }
 0x2d5   : > { %v1785_v39 = vpop.eup %1784  ;;  %v1460_v44 = vadd.f32 -1.0, %v1783_v41  ;;  %1796 = vpow2.f32 %v1082_v40  ;;  %v1618_v37 = vpop.f32.mrb[28].mxu0  ;;  %1636 = vmatprep.mubr.bf16.mxu0 %v1128_v42 }
 0x2d6   : > { %v1787_v46 = vpop.eup %1786  ;;  %v2164_v47 = vadd.f32 %v1618_v37, %v2125_v56  ;;  %v1033_v48 = vpop.f32.mrb[29].mxu0  ;;  %v1458_v54 = vadd.f32 -1.0, %v1785_v39  ;;  %1637 = vmatmul.mubr.bf16.vlgmr.msra.gmra.mrb[32].mxu0 %v1129_v23 }
 0x2d7   : > { %v1789_v49 = vpop.eup %1788  ;;  %v1461_v50 = vadd.f32 -1.0, %v1787_v46  ;;  %v1034_v51 = vadd.f32 %v2125_v56, %v1033_v48  ;;  %v1619_v53 = vpop.f32.mrb[30].mxu0  ;;  %v1118_v59 = vsel %vm1054_vm7, %v2132_v5, %v1460_v44 }
 0x2d8   : > { %v1459_v55 = vadd.f32 -1.0, %v1789_v49  ;;  %v1092_v58 = vmul.f32 1.442695, %v2164_v47  ;;  %v1045_v52 = vadd.f32 %v1619_v53, %v2125_v56  ;;  %v1036_v57 = vpop.f32.mrb[31].mxu0  ;;  %v1116_v3 = vsel %vm1052_vm9, %v2135_v10, %v1458_v54 }
 0x2d9   : > { %v1119_v60 = vsel %vm1055_vm8, %v2139_v13, %v1461_v50  ;;  %v1088_v61 = vmul.f32 1.442695, %v1034_v51  ;;  %v1037_v62 = vadd.f32 %v2125_v56, %v1036_v57  ;;  %vm1062_vm15 = vcmp.gt.f32.partialorder %v2164_v47, 0.0 }
 0x2da   : > { %v1131_v63 = vpack.c.bf16 %v1119_v60, %v1118_v59  ;;  %1798 = vpow2.f32 %v1092_v58  ;;  %v1094_v0 = vmul.f32 1.442695, %v1045_v52  ;;  %v1117_v4 = vsel %vm1053_vm10, %v2143_v16, %v1459_v55 }
 0x2db   : > { %1800 = vpow2.f32 %v1088_v61  ;;  %v1090_v1 = vmul.f32 1.442695, %v1037_v62  ;;  %v1130_v11 = vpack.c.bf16 %v1117_v4, %v1116_v3  ;;  %vm1063_vm0 = vcmp.gt.f32.partialorder %v1045_v52, 0.0 }
 0x2dc   : > { %v1791_v2 = vpop.eup %1790  ;;  %1802 = vpow2.f32 %v1094_v0  ;;  %vm1060_vm1 = vcmp.gt.f32.partialorder %v1034_v51, 0.0  ;;  %vm1061_vm2 = vcmp.gt.f32.partialorder %v1037_v62, 0.0 }
 0x2dd   : > { %v1793_v5 = vpop.eup %1792  ;;  %v1464_v9 = vadd.f32 -1.0, %v1791_v2  ;;  %1804 = vpow2.f32 %v1090_v1  ;;  %1640 = vmatprep.mubr.bf16.mxu1 %v1130_v11 }
 0x2de   : > { %v1795_v56 = vpop.eup %1794  ;;  %v1462_v12 = vadd.f32 -1.0, %v1793_v5  ;;  %1641 = vmatmul.mubr.bf16.vlgmr.msra.gmra.mrb[16].mxu1 %v1131_v63 }
 0x2df   : > { %v1797_v13 = vpop.eup %1796  ;;  %v1465_v14 = vadd.f32 -1.0, %v1795_v56  ;;  %v1122_v10 = vsel %vm1058_vm11, %v2148_v24, %v1464_v9 }
 0x2e0   : > { %v1463_v15 = vadd.f32 -1.0, %v1797_v13  ;;  %v1120_v17 = vsel %vm1056_vm13, %v2151_v29, %v1462_v12 }
 0x2e1   : > { %v1123_v16 = vsel %vm1059_vm12, %v2155_v28, %v1465_v14 }
 0x2e2   : > { %v1121_v18 = vsel %vm1057_vm14, %v2159_v36, %v1463_v15  ;;  %v1133_v19 = vpack.c.bf16 %v1123_v16, %v1122_v10 }
 0x2e3   : > { %v1132_v20 = vpack.c.bf16 %v1121_v18, %v1120_v17 }
 0x2e4   : > { %v1799_v21 = vpop.eup %1798 }
 0x2e5   : > { %v1801_v8 = vpop.eup %1800  ;;  %v1468_v6 = vadd.f32 -1.0, %v1799_v21  ;;  %1644 = vmatprep.mubr.bf16.mxu1 %v1132_v20 }
 0x2e6   : > { %v1803_v26 = vpop.eup %1802  ;;  %v1466_v25 = vadd.f32 -1.0, %v1801_v8  ;;  %1645 = vmatmul.mubr.bf16.gmra.mrb[20].mxu1 %v1133_v19 }
 0x2e7   : > { %v1805_v27 = vpop.eup %1804  ;;  %v1469_v30 = vadd.f32 -1.0, %v1803_v26  ;;  %v1126_v29 = vsel %vm1062_vm15, %v2164_v47, %v1468_v6 }
 0x2e8   : > { %v1467_v24 = vadd.f32 -1.0, %v1805_v27  ;;  %v1124_v32 = vsel %vm1060_vm1, %v1034_v51, %v1466_v25 }
 0x2e9   : > { %v1127_v31 = vsel %vm1063_vm0, %v1045_v52, %v1469_v30 }
 0x2ea   : > { %v1125_v22 = vsel %vm1061_vm2, %v1037_v62, %v1467_v24  ;;  %v1135_v28 = vpack.c.bf16 %v1127_v31, %v1126_v29 }
 0x2eb   : > { %v1134_v7 = vpack.c.bf16 %v1125_v22, %v1124_v32 }
 0x2ed   : > { %1648 = vmatprep.mubr.bf16.mxu1 %v1134_v7 }
 0x2ee   : > { %1649 = vmatmul.mubr.bf16.gmra.mrb[24].mxu1 %v1135_v28 }
 0x3a9   : > { %v1638_v34 = vpop.f32.mrb[32].mxu0 }
 0x3aa   : > { %v1250_v35 = vadd.f32 %v1638_v34, %v1470_v33  ;;  %v1241_v36 = vpop.f32.mrb[33].mxu0 }
 0x3ab   : > { %v1242_v23 = vadd.f32 %v1470_v33, %v1241_v36  ;;  %v1639_v38 = vpop.f32.mrb[34].mxu0 }
 0x3ac   : > { %1307 = vst.msk [vmem:[%s2195_s20 + $0x10] sm:$0xff] %vm1304_vm3, %v1250_v35  ;;  %v1253_v40 = vadd.f32 %v1639_v38, %v1470_v33  ;;  %v1244_v41 = vpop.f32.mrb[35].mxu0 }
 0x3ad   : > { %1305 = vst.msk [vmem:[%s2195_s20] sm:$0xff] %vm1304_vm3, %v1242_v23  ;;  %v1245_v43 = vadd.f32 %v1470_v33, %v1244_v41 }
 0x3ae   : > { %1308 = vst.msk [vmem:[%s2195_s20 + $0x18] sm:$0xff] %vm1304_vm3, %v1253_v40 }
 0x3af   : > { %1306 = vst.msk [vmem:[%s2195_s20 + $0x8] sm:$0xff] %vm1304_vm3, %v1245_v43 }
 0x3b1   : > { %v1642_v45 = vpop.f32.mrb[16].mxu1 }
 0x3b2   : > { %v1266_v39 = vadd.f32 %v1642_v45, %v1470_v33  ;;  %v1257_v44 = vpop.f32.mrb[17].mxu1 }
 0x3b3   : > { %v1258_v37 = vadd.f32 %v1470_v33, %v1257_v44  ;;  %v1643_v42 = vpop.f32.mrb[18].mxu1 }
 0x3b4   : > { %1311 = vst.msk [vmem:[%s2195_s20 + $0x30] sm:$0xff] %vm1304_vm3, %v1266_v39  ;;  %v1269_v46 = vadd.f32 %v1643_v42, %v1470_v33  ;;  %v1260_v47 = vpop.f32.mrb[19].mxu1 }
 0x3b5   : > { %1309 = vst.msk [vmem:[%s2195_s20 + $0x20] sm:$0xff] %vm1304_vm3, %v1258_v37  ;;  %v1261_v48 = vadd.f32 %v1470_v33, %v1260_v47 }
 0x3b6   : > { %1312 = vst.msk [vmem:[%s2195_s20 + $0x38] sm:$0xff] %vm1304_vm3, %v1269_v46 }
 0x3b7   : > { %1310 = vst.msk [vmem:[%s2195_s20 + $0x28] sm:$0xff] %vm1304_vm3, %v1261_v48 }
 0x3b9   : > { %v1646_v49 = vpop.f32.mrb[20].mxu1 }
 0x3ba   : > { %v1282_v50 = vadd.f32 %v1646_v49, %v1470_v33  ;;  %v1273_v51 = vpop.f32.mrb[21].mxu1 }
 0x3bb   : > { %v1274_v53 = vadd.f32 %v1470_v33, %v1273_v51  ;;  %v1647_v54 = vpop.f32.mrb[22].mxu1 }
 0x3bc   : > { %1315 = vst.msk [vmem:[%s2195_s20 + $0x50] sm:$0xff] %vm1304_vm3, %v1282_v50  ;;  %v1285_v55 = vadd.f32 %v1647_v54, %v1470_v33  ;;  %v1276_v58 = vpop.f32.mrb[23].mxu1 }
 0x3bd   : > { %1313 = vst.msk [vmem:[%s2195_s20 + $0x40] sm:$0xff] %vm1304_vm3, %v1274_v53  ;;  %v1277_v52 = vadd.f32 %v1470_v33, %v1276_v58 }
 0x3be   : > { %1316 = vst.msk [vmem:[%s2195_s20 + $0x58] sm:$0xff] %vm1304_vm3, %v1285_v55 }
 0x3bf   : > { %1314 = vst.msk [vmem:[%s2195_s20 + $0x48] sm:$0xff] %vm1304_vm3, %v1277_v52 }
 0x3c1   : > { %v1650_v57 = vpop.f32.mrb[24].mxu1 }
 0x3c2   : > { %v1298_v59 = vadd.f32 %v1650_v57, %v1470_v33  ;;  %v1289_v60 = vpop.f32.mrb[25].mxu1 }
 0x3c3   : > { %v1290_v61 = vadd.f32 %v1470_v33, %v1289_v60  ;;  %v1651_v62 = vpop.f32.mrb[26].mxu1 }
 0x3c4   : > { %1319 = vst.msk [vmem:[%s2195_s20 + $0x70] sm:$0xff] %vm1304_vm3, %v1298_v59  ;;  %v1301_v63 = vadd.f32 %v1651_v62, %v1470_v33  ;;  %v1292_v0 = vpop.f32.mrb[27].mxu1 }
 0x3c5   : > { %1317 = vst.msk [vmem:[%s2195_s20 + $0x60] sm:$0xff] %vm1304_vm3, %v1290_v61  ;;  %v1293_v1 = vadd.f32 %v1470_v33, %v1292_v0 }
 0x3c6   : > { %1320 = vst.msk [vmem:[%s2195_s20 + $0x78] sm:$0xff] %vm1304_vm3, %v1301_v63 }
 0x3c7   : > { %1318 = vst.msk [vmem:[%s2195_s20 + $0x68] sm:$0xff] %vm1304_vm3, %v1293_v1 }
 0x3c8 PF: > { %s19_s30 = sadd.s32 1, %s1812_s30  }
 0x3c9   : > { %p16_p4 = scmp.ge.s32.totalorder %s19_s30, 4  }
 0x3cb   :  { %18 = sbr.rel (!%p16_p4) target bundleno = 1 (0x1), region = 86 }

</bundles_post_ra>
